<compile_context>
chip_gen: v7x
topology: tpu7x:2x2x1
jax: 0.10.0
libtpu: 0.0.40
codegen_flags: <defaults>
</compile_context>

<pallas_src>
import functools

import jax
import jax.numpy as jnp
from jax.experimental import pallas as pl
from jax.experimental.pallas import tpu as pltpu

JITTER = 1e-5  # ridge added to the normal equations for numerical stability


# ---------------------------------------------------------------------------
# Fused kernel: basis -> Gram -> 4x4 ridge inverse -> fused projector -> head
# ---------------------------------------------------------------------------
def vpnet_kernel(alpha_col_ref, alpha_row_ref, t_row_ref, t_col_ref, x_ref,
                 w1t_ref, b1_ref, w2t_ref, b2_ref, y_ref, xfit_ref):
    # Per-batch-tile input; upcast in-kernel (native-dtype DMA in the wrapper).
    x = x_ref[...].astype(jnp.float32)                         # (Bt, M)

    # --- batch-invariant prelude (tiny; recomputed each grid step) ----------
    # Basis built directly in both layouts -> no XLU transpose downstream.
    phi_km = jnp.exp(-alpha_col_ref[...] * t_row_ref[...])     # (K, M) = Phi^T
    phi_mk = jnp.exp(-t_col_ref[...] * alpha_row_ref[...])     # (M, K) = Phi
    k = phi_km.shape[0]

    # Gram matrix of the basis on the MXU (clean last/first contraction).
    g = jnp.dot(phi_km, phi_mk, preferred_element_type=jnp.float32)   # (K, K)
    a = g + JITTER * jnp.eye(k, dtype=jnp.float32)

    # Unrolled Gauss-Jordan inverse of the SPD 4x4 (exact reciprocal pivots;
    # operates only on (1, K) rows — no batch-scaled lane slicing).
    eye = jnp.eye(k, dtype=jnp.float32)
    a_rows = [a[i:i + 1, :] for i in range(k)]
    inv_rows = [eye[i:i + 1, :] for i in range(k)]
    for i in range(k):
        inv_p = 1.0 / a_rows[i][:, i:i + 1]                    # (1, 1) pivot
        a_rows[i] = a_rows[i] * inv_p
        inv_rows[i] = inv_rows[i] * inv_p
        for j in range(k):
            if j == i:
                continue
            f_ji = a_rows[j][:, i:i + 1]                        # (1, 1)
            a_rows[j] = a_rows[j] - f_ji * a_rows[i]
            inv_rows[j] = inv_rows[j] - f_ji * inv_rows[i]
    a_inv = jnp.concatenate(inv_rows, axis=0)                   # (K, K)

    # Fused batch-invariant operators.
    p_km = jnp.dot(a_inv, phi_km, preferred_element_type=jnp.float32)   # (K, M)
    proj = jnp.dot(phi_mk, p_km, preferred_element_type=jnp.float32)    # (M, M)
    w1x = jnp.dot(phi_mk,
                  jnp.dot(a_inv, w1t_ref[...],
                          preferred_element_type=jnp.float32),
                  preferred_element_type=jnp.float32)                   # (M, H)

    # --- per-batch path: full-128-lane MXU contractions ----------------------
    # x_fit = Phi (Phi^T Phi + lI)^-1 Phi^T x  ==  x @ Proj
    xfit_ref[...] = jnp.dot(x, proj, preferred_element_type=jnp.float32)

    # classifier head: lin2(relu(lin1(coeff))), with lin1 folded into W1x
    h = jnp.maximum(
        jnp.dot(x, w1x, preferred_element_type=jnp.float32) + b1_ref[...], 0.0)
    y_ref[...] = jnp.dot(h, w2t_ref[...],
                         preferred_element_type=jnp.float32) + b2_ref[...]


# ---------------------------------------------------------------------------
# Wrapper
# ---------------------------------------------------------------------------
def _pick_batch_tile(batch: int, target: int = 512) -> int:
    """Largest tile <= `target` rows that divides `batch` and keeps (8,128)
    alignment.  Small batches use a single full-batch block (grid of 1)."""
    if batch <= target or batch % 8 != 0:
        return batch
    start = (min(target, batch) // 8) * 8
    for bt in range(start, 7, -8):
        if batch % bt == 0:
            return bt
    return batch


@functools.partial(jax.jit, static_argnames=("batch_tile",))
def vpnet_forward(x, alpha, lin1_w, lin1_b, lin2_w, lin2_b, t,
                  batch_tile=None):
    """Returns (y_pred, x_fit) exactly like VPNet.forward."""
    batch, m = x.shape
    k = alpha.shape[0]
    h = lin1_w.shape[0]
    c = lin2_w.shape[0]

    bt = _pick_batch_tile(batch) if batch_tile is None else int(batch_tile)
    if batch % bt != 0:
        raise ValueError(f"batch_tile={bt} must divide batch={batch}")
    if bt != batch and (bt % 8 != 0 or m % 128 != 0):
        raise ValueError("batch tile must be a multiple of 8 (and M of 128) "
                         "unless it covers the whole array")
    nb = batch // bt

    alpha_col = alpha.reshape(k, 1).astype(jnp.float32)
    alpha_row = alpha.reshape(1, k).astype(jnp.float32)
    t_row = t.reshape(1, m).astype(jnp.float32)
    t_col = t.reshape(m, 1).astype(jnp.float32)
    # torch.nn.Linear stores W as (out, in) and computes x @ W^T + b;
    # pass W^T so the kernel never transposes.
    w1t = lin1_w.T.astype(jnp.float32)                # (K, H)
    w2t = lin2_w.T.astype(jnp.float32)                # (H, C)
    b1r = lin1_b.reshape(1, h).astype(jnp.float32)
    b2r = lin2_b.reshape(1, c).astype(jnp.float32)

    y_pred, x_fit = pl.pallas_call(
        vpnet_kernel,
        grid=(nb,),
        in_specs=[
            pl.BlockSpec((k, 1), lambda i: (0, 0)),    # alpha column
            pl.BlockSpec((1, k), lambda i: (0, 0)),    # alpha row
            pl.BlockSpec((1, m), lambda i: (0, 0)),    # t row
            pl.BlockSpec((m, 1), lambda i: (0, 0)),    # t column
            pl.BlockSpec((bt, m), lambda i: (i, 0)),   # x (batch-tiled, native dtype)
            pl.BlockSpec((k, h), lambda i: (0, 0)),    # W1^T
            pl.BlockSpec((1, h), lambda i: (0, 0)),    # b1
            pl.BlockSpec((h, c), lambda i: (0, 0)),    # W2^T
            pl.BlockSpec((1, c), lambda i: (0, 0)),    # b2
        ],
        out_specs=[
            pl.BlockSpec((bt, c), lambda i: (i, 0)),   # y_pred
            pl.BlockSpec((bt, m), lambda i: (i, 0)),   # x_fit (lane-dense)
        ],
        out_shape=[
            jax.ShapeDtypeStruct((batch, c), jnp.float32),
            jax.ShapeDtypeStruct((batch, m), jnp.float32),
        ],
        compiler_params=pltpu.CompilerParams(
            dimension_semantics=("parallel",)),
    )(alpha_col, alpha_row, t_row, t_col, x, w1t, b1r, w2t, b2r)
    return y_pred, x_fit


# ---------------------------------------------------------------------------
# Demo / smoke test
# ---------------------------------------------------------------------------
if __name__ == "__main__":
    # Config analogue: n_samples=128, n_coeffs=4, vp_lin_weights=32, n_classes=8
    B, M, K, H, C = 16, 128, 4, 32, 8

    key = jax.random.PRNGKey(0)
    kx, k1, k2, k3, k4 = jax.random.split(key, 5)

    x = jax.random.normal(kx, (B, M), dtype=jnp.float32)
    alpha_init = jnp.array([0.5, 2.0, 5.0, 10.0], dtype=jnp.float32)   # (K,)
    t = jnp.linspace(0.0, 1.0, M, dtype=jnp.float32)

    # torch.nn.Linear default init analogue: U(-1/sqrt(fan_in), 1/sqrt(fan_in))
    lim1 = 1.0 / (K ** 0.5)
    lim2 = 1.0 / (H ** 0.5)
    lin1_w = jax.random.uniform(k1, (H, K), jnp.float32, -lim1, lim1)
    lin1_b = jax.random.uniform(k2, (H,), jnp.float32, -lim1, lim1)
    lin2_w = jax.random.uniform(k3, (C, H), jnp.float32, -lim2, lim2)
    lin2_b = jax.random.uniform(k4, (C,), jnp.float32, -lim2, lim2)

    y_pred, x_fit = vpnet_forward(x, alpha_init, lin1_w, lin1_b, lin2_w,
                                  lin2_b, t)
    jax.block_until_ready((y_pred, x_fit))

    assert y_pred.shape == (B, C) and x_fit.shape == (B, M)
    assert bool(jnp.all(jnp.isfinite(y_pred)))
    assert bool(jnp.all(jnp.isfinite(x_fit)))

    # Pure-JAX reference of the same ridge-regularized least squares + head.
    with jax.default_matmul_precision("float32"):
        F = jnp.exp(-t[:, None] * alpha_init[None, :])            # (M, K)
        A = F.T @ F + JITTER * jnp.eye(K, dtype=jnp.float32)
        coeff_ref = jnp.linalg.solve(A, F.T @ x.T).T              # (B, K)
        x_fit_ref = coeff_ref @ F.T                               # (B, M)
        h_ref = jnp.maximum(coeff_ref @ lin1_w.T + lin1_b, 0.0)
        y_ref = h_ref @ lin2_w.T + lin2_b
    assert bool(jnp.allclose(x_fit, x_fit_ref, atol=1e-2, rtol=1e-2))
    assert bool(jnp.allclose(y_pred, y_ref, atol=1e-2, rtol=1e-2))

    # least-squares fit is (approximately) an orthogonal projection of x
    assert bool(jnp.all(jnp.linalg.norm(x_fit, axis=1)
                        <= 1.05 * jnp.linalg.norm(x, axis=1)))
    print("KERNEL_OK")
</pallas_src>

<mosaic_0001>
module attributes {stable_mosaic.version = 11 : i64} {
  func.func @vpnet_kernel(%arg0: i32, %arg1: memref<4x1xf32, #tpu.memory_space<vmem>>, %arg2: memref<1x4xf32, #tpu.memory_space<vmem>>, %arg3: memref<1x128xf32, #tpu.memory_space<vmem>>, %arg4: memref<128x1xf32, #tpu.memory_space<vmem>>, %arg5: memref<16x128xf32, #tpu.memory_space<vmem>>, %arg6: memref<4x32xf32, #tpu.memory_space<vmem>>, %arg7: memref<1x32xf32, #tpu.memory_space<vmem>>, %arg8: memref<32x8xf32, #tpu.memory_space<vmem>>, %arg9: memref<1x8xf32, #tpu.memory_space<vmem>>, %arg10: memref<16x8xf32, #tpu.memory_space<vmem>>, %arg11: memref<16x128xf32, #tpu.memory_space<vmem>>) attributes {dimension_semantics = [#tpu.dimension_semantics<parallel>], iteration_bounds = array<i64: 1>, scalar_prefetch = 0 : i64, scratch_operands = 0 : i64, tpu.core_type = #tpu.core_type<tc>, window_params = [{pipeline_mode = #tpu.pipeline_mode<synchronous>, transform_indices = @transform_0, window_bounds = array<i64: 4, 1>}, {pipeline_mode = #tpu.pipeline_mode<synchronous>, transform_indices = @transform_1, window_bounds = array<i64: 1, 4>}, {pipeline_mode = #tpu.pipeline_mode<synchronous>, transform_indices = @transform_2, window_bounds = array<i64: 1, 128>}, {pipeline_mode = #tpu.pipeline_mode<synchronous>, transform_indices = @transform_3, window_bounds = array<i64: 128, 1>}, {transform_indices = @transform_4, window_bounds = array<i64: 16, 128>}, {pipeline_mode = #tpu.pipeline_mode<synchronous>, transform_indices = @transform_5, window_bounds = array<i64: 4, 32>}, {pipeline_mode = #tpu.pipeline_mode<synchronous>, transform_indices = @transform_6, window_bounds = array<i64: 1, 32>}, {pipeline_mode = #tpu.pipeline_mode<synchronous>, transform_indices = @transform_7, window_bounds = array<i64: 32, 8>}, {pipeline_mode = #tpu.pipeline_mode<synchronous>, transform_indices = @transform_8, window_bounds = array<i64: 1, 8>}, {transform_indices = @transform_9, window_bounds = array<i64: 16, 8>}, {transform_indices = @transform_10, window_bounds = array<i64: 16, 128>}]} {
    %c0 = arith.constant 0 : index
    %c0_0 = arith.constant 0 : index
    %0 = vector.load %arg5[%c0, %c0_0] : memref<16x128xf32, #tpu.memory_space<vmem>>, vector<16x128xf32>
    %c0_1 = arith.constant 0 : index
    %c0_2 = arith.constant 0 : index
    %1 = vector.load %arg1[%c0_1, %c0_2] : memref<4x1xf32, #tpu.memory_space<vmem>>, vector<4x1xf32>
    %cst = arith.constant 0.000000e+00 : f32
    %2 = vector.broadcast %cst : f32 to vector<4x1xf32>
    %3 = arith.subf %2, %1 : vector<4x1xf32>
    %c0_3 = arith.constant 0 : index
    %c0_4 = arith.constant 0 : index
    %4 = vector.load %arg3[%c0_3, %c0_4] : memref<1x128xf32, #tpu.memory_space<vmem>>, vector<1x128xf32>
    %5 = vector.broadcast %3 : vector<4x1xf32> to vector<4x128xf32>
    %6 = vector.broadcast %4 : vector<1x128xf32> to vector<4x128xf32>
    %7 = arith.mulf %5, %6 : vector<4x128xf32>
    %8 = math.exp %7 : vector<4x128xf32>
    %c0_5 = arith.constant 0 : index
    %c0_6 = arith.constant 0 : index
    %9 = vector.load %arg4[%c0_5, %c0_6] : memref<128x1xf32, #tpu.memory_space<vmem>>, vector<128x1xf32>
    %cst_7 = arith.constant 0.000000e+00 : f32
    %10 = vector.broadcast %cst_7 : f32 to vector<128x1xf32>
    %11 = arith.subf %10, %9 : vector<128x1xf32>
    %c0_8 = arith.constant 0 : index
    %c0_9 = arith.constant 0 : index
    %12 = vector.load %arg2[%c0_8, %c0_9] : memref<1x4xf32, #tpu.memory_space<vmem>>, vector<1x4xf32>
    %13 = vector.broadcast %11 : vector<128x1xf32> to vector<128x4xf32>
    %14 = vector.broadcast %12 : vector<1x4xf32> to vector<128x4xf32>
    %15 = arith.mulf %13, %14 : vector<128x4xf32>
    %16 = math.exp %15 : vector<128x4xf32>
    %cst_10 = arith.constant dense<0.000000e+00> : vector<4x4xf32>
    %17 = tpu.matmul %8, %16, %cst_10 {dimension_numbers = #tpu.dot_dimension_numbers<[1], [0], [0], [1], [0, 0, 1, 1], [], []>} : vector<4x128xf32>, vector<128x4xf32>, vector<4x4xf32> -> vector<4x4xf32>
    %18 = tpu.iota {dimensions = array<i32: 0>} : vector<4x4xi32>
    %19 = tpu.iota {dimensions = array<i32: 1>} : vector<4x4xi32>
    %c0_i32 = arith.constant 0 : i32
    %20 = vector.broadcast %c0_i32 : i32 to vector<4x4xi32>
    %21 = arith.addi %18, %20 : vector<4x4xi32>
    %22 = arith.cmpi eq, %21, %19 : vector<4x4xi32>
    %23 = arith.extui %22 : vector<4x4xi1> to vector<4x4xi32>
    %24 = arith.sitofp %23 : vector<4x4xi32> to vector<4x4xf32>
    %cst_11 = arith.constant 9.99999974E-6 : f32
    %25 = vector.broadcast %cst_11 : f32 to vector<4x4xf32>
    %26 = arith.mulf %25, %24 : vector<4x4xf32>
    %27 = arith.addf %17, %26 : vector<4x4xf32>
    %28 = tpu.iota {dimensions = array<i32: 0>} : vector<4x4xi32>
    %29 = tpu.iota {dimensions = array<i32: 1>} : vector<4x4xi32>
    %c0_i32_12 = arith.constant 0 : i32
    %30 = vector.broadcast %c0_i32_12 : i32 to vector<4x4xi32>
    %31 = arith.addi %28, %30 : vector<4x4xi32>
    %32 = arith.cmpi eq, %31, %29 : vector<4x4xi32>
    %33 = arith.extui %32 : vector<4x4xi1> to vector<4x4xi32>
    %34 = arith.sitofp %33 : vector<4x4xi32> to vector<4x4xf32>
    %35 = vector.extract_strided_slice %27 {offsets = [0, 0], sizes = [1, 4], strides = [1, 1]} : vector<4x4xf32> to vector<1x4xf32>
    %36 = vector.extract_strided_slice %27 {offsets = [1, 0], sizes = [1, 4], strides = [1, 1]} : vector<4x4xf32> to vector<1x4xf32>
    %37 = vector.extract_strided_slice %27 {offsets = [2, 0], sizes = [1, 4], strides = [1, 1]} : vector<4x4xf32> to vector<1x4xf32>
    %38 = vector.extract_strided_slice %27 {offsets = [3, 0], sizes = [1, 4], strides = [1, 1]} : vector<4x4xf32> to vector<1x4xf32>
    %39 = vector.extract_strided_slice %34 {offsets = [0, 0], sizes = [1, 4], strides = [1, 1]} : vector<4x4xf32> to vector<1x4xf32>
    %40 = vector.extract_strided_slice %34 {offsets = [1, 0], sizes = [1, 4], strides = [1, 1]} : vector<4x4xf32> to vector<1x4xf32>
    %41 = vector.extract_strided_slice %34 {offsets = [2, 0], sizes = [1, 4], strides = [1, 1]} : vector<4x4xf32> to vector<1x4xf32>
    %42 = vector.extract_strided_slice %34 {offsets = [3, 0], sizes = [1, 4], strides = [1, 1]} : vector<4x4xf32> to vector<1x4xf32>
    %43 = vector.extract_strided_slice %35 {offsets = [0, 0], sizes = [1, 1], strides = [1, 1]} : vector<1x4xf32> to vector<1x1xf32>
    %cst_13 = arith.constant 1.000000e+00 : f32
    %44 = vector.broadcast %cst_13 : f32 to vector<1x1xf32>
    %45 = arith.divf %44, %43 : vector<1x1xf32>
    %46 = vector.broadcast %45 : vector<1x1xf32> to vector<1x4xf32>
    %47 = arith.mulf %35, %46 : vector<1x4xf32>
    %48 = vector.broadcast %45 : vector<1x1xf32> to vector<1x4xf32>
    %49 = arith.mulf %39, %48 : vector<1x4xf32>
    %50 = vector.extract_strided_slice %36 {offsets = [0, 0], sizes = [1, 1], strides = [1, 1]} : vector<1x4xf32> to vector<1x1xf32>
    %51 = vector.broadcast %50 : vector<1x1xf32> to vector<1x4xf32>
    %52 = arith.mulf %51, %47 : vector<1x4xf32>
    %53 = arith.subf %36, %52 : vector<1x4xf32>
    %54 = vector.broadcast %50 : vector<1x1xf32> to vector<1x4xf32>
    %55 = arith.mulf %54, %49 : vector<1x4xf32>
    %56 = arith.subf %40, %55 : vector<1x4xf32>
    %57 = vector.extract_strided_slice %37 {offsets = [0, 0], sizes = [1, 1], strides = [1, 1]} : vector<1x4xf32> to vector<1x1xf32>
    %58 = vector.broadcast %57 : vector<1x1xf32> to vector<1x4xf32>
    %59 = arith.mulf %58, %47 : vector<1x4xf32>
    %60 = arith.subf %37, %59 : vector<1x4xf32>
    %61 = vector.broadcast %57 : vector<1x1xf32> to vector<1x4xf32>
    %62 = arith.mulf %61, %49 : vector<1x4xf32>
    %63 = arith.subf %41, %62 : vector<1x4xf32>
    %64 = vector.extract_strided_slice %38 {offsets = [0, 0], sizes = [1, 1], strides = [1, 1]} : vector<1x4xf32> to vector<1x1xf32>
    %65 = vector.broadcast %64 : vector<1x1xf32> to vector<1x4xf32>
    %66 = arith.mulf %65, %47 : vector<1x4xf32>
    %67 = arith.subf %38, %66 : vector<1x4xf32>
    %68 = vector.broadcast %64 : vector<1x1xf32> to vector<1x4xf32>
    %69 = arith.mulf %68, %49 : vector<1x4xf32>
    %70 = arith.subf %42, %69 : vector<1x4xf32>
    %71 = vector.extract_strided_slice %53 {offsets = [0, 1], sizes = [1, 1], strides = [1, 1]} : vector<1x4xf32> to vector<1x1xf32>
    %cst_14 = arith.constant 1.000000e+00 : f32
    %72 = vector.broadcast %cst_14 : f32 to vector<1x1xf32>
    %73 = arith.divf %72, %71 : vector<1x1xf32>
    %74 = vector.broadcast %73 : vector<1x1xf32> to vector<1x4xf32>
    %75 = arith.mulf %53, %74 : vector<1x4xf32>
    %76 = vector.broadcast %73 : vector<1x1xf32> to vector<1x4xf32>
    %77 = arith.mulf %56, %76 : vector<1x4xf32>
    %78 = vector.extract_strided_slice %47 {offsets = [0, 1], sizes = [1, 1], strides = [1, 1]} : vector<1x4xf32> to vector<1x1xf32>
    %79 = vector.broadcast %78 : vector<1x1xf32> to vector<1x4xf32>
    %80 = arith.mulf %79, %75 : vector<1x4xf32>
    %81 = arith.subf %47, %80 : vector<1x4xf32>
    %82 = vector.broadcast %78 : vector<1x1xf32> to vector<1x4xf32>
    %83 = arith.mulf %82, %77 : vector<1x4xf32>
    %84 = arith.subf %49, %83 : vector<1x4xf32>
    %85 = vector.extract_strided_slice %60 {offsets = [0, 1], sizes = [1, 1], strides = [1, 1]} : vector<1x4xf32> to vector<1x1xf32>
    %86 = vector.broadcast %85 : vector<1x1xf32> to vector<1x4xf32>
    %87 = arith.mulf %86, %75 : vector<1x4xf32>
    %88 = arith.subf %60, %87 : vector<1x4xf32>
    %89 = vector.broadcast %85 : vector<1x1xf32> to vector<1x4xf32>
    %90 = arith.mulf %89, %77 : vector<1x4xf32>
    %91 = arith.subf %63, %90 : vector<1x4xf32>
    %92 = vector.extract_strided_slice %67 {offsets = [0, 1], sizes = [1, 1], strides = [1, 1]} : vector<1x4xf32> to vector<1x1xf32>
    %93 = vector.broadcast %92 : vector<1x1xf32> to vector<1x4xf32>
    %94 = arith.mulf %93, %75 : vector<1x4xf32>
    %95 = arith.subf %67, %94 : vector<1x4xf32>
    %96 = vector.broadcast %92 : vector<1x1xf32> to vector<1x4xf32>
    %97 = arith.mulf %96, %77 : vector<1x4xf32>
    %98 = arith.subf %70, %97 : vector<1x4xf32>
    %99 = vector.extract_strided_slice %88 {offsets = [0, 2], sizes = [1, 1], strides = [1, 1]} : vector<1x4xf32> to vector<1x1xf32>
    %cst_15 = arith.constant 1.000000e+00 : f32
    %100 = vector.broadcast %cst_15 : f32 to vector<1x1xf32>
    %101 = arith.divf %100, %99 : vector<1x1xf32>
    %102 = vector.broadcast %101 : vector<1x1xf32> to vector<1x4xf32>
    %103 = arith.mulf %88, %102 : vector<1x4xf32>
    %104 = vector.broadcast %101 : vector<1x1xf32> to vector<1x4xf32>
    %105 = arith.mulf %91, %104 : vector<1x4xf32>
    %106 = vector.extract_strided_slice %81 {offsets = [0, 2], sizes = [1, 1], strides = [1, 1]} : vector<1x4xf32> to vector<1x1xf32>
    %107 = vector.broadcast %106 : vector<1x1xf32> to vector<1x4xf32>
    %108 = arith.mulf %107, %103 : vector<1x4xf32>
    %109 = arith.subf %81, %108 : vector<1x4xf32>
    %110 = vector.broadcast %106 : vector<1x1xf32> to vector<1x4xf32>
    %111 = arith.mulf %110, %105 : vector<1x4xf32>
    %112 = arith.subf %84, %111 : vector<1x4xf32>
    %113 = vector.extract_strided_slice %75 {offsets = [0, 2], sizes = [1, 1], strides = [1, 1]} : vector<1x4xf32> to vector<1x1xf32>
    %114 = vector.broadcast %113 : vector<1x1xf32> to vector<1x4xf32>
    %115 = arith.mulf %114, %103 : vector<1x4xf32>
    %116 = arith.subf %75, %115 : vector<1x4xf32>
    %117 = vector.broadcast %113 : vector<1x1xf32> to vector<1x4xf32>
    %118 = arith.mulf %117, %105 : vector<1x4xf32>
    %119 = arith.subf %77, %118 : vector<1x4xf32>
    %120 = vector.extract_strided_slice %95 {offsets = [0, 2], sizes = [1, 1], strides = [1, 1]} : vector<1x4xf32> to vector<1x1xf32>
    %121 = vector.broadcast %120 : vector<1x1xf32> to vector<1x4xf32>
    %122 = arith.mulf %121, %103 : vector<1x4xf32>
    %123 = arith.subf %95, %122 : vector<1x4xf32>
    %124 = vector.broadcast %120 : vector<1x1xf32> to vector<1x4xf32>
    %125 = arith.mulf %124, %105 : vector<1x4xf32>
    %126 = arith.subf %98, %125 : vector<1x4xf32>
    %127 = vector.extract_strided_slice %123 {offsets = [0, 3], sizes = [1, 1], strides = [1, 1]} : vector<1x4xf32> to vector<1x1xf32>
    %cst_16 = arith.constant 1.000000e+00 : f32
    %128 = vector.broadcast %cst_16 : f32 to vector<1x1xf32>
    %129 = arith.divf %128, %127 : vector<1x1xf32>
    %130 = vector.broadcast %129 : vector<1x1xf32> to vector<1x4xf32>
    %131 = arith.mulf %126, %130 : vector<1x4xf32>
    %132 = vector.extract_strided_slice %109 {offsets = [0, 3], sizes = [1, 1], strides = [1, 1]} : vector<1x4xf32> to vector<1x1xf32>
    %133 = vector.broadcast %132 : vector<1x1xf32> to vector<1x4xf32>
    %134 = arith.mulf %133, %131 : vector<1x4xf32>
    %135 = arith.subf %112, %134 : vector<1x4xf32>
    %136 = vector.extract_strided_slice %116 {offsets = [0, 3], sizes = [1, 1], strides = [1, 1]} : vector<1x4xf32> to vector<1x1xf32>
    %137 = vector.broadcast %136 : vector<1x1xf32> to vector<1x4xf32>
    %138 = arith.mulf %137, %131 : vector<1x4xf32>
    %139 = arith.subf %119, %138 : vector<1x4xf32>
    %140 = vector.extract_strided_slice %103 {offsets = [0, 3], sizes = [1, 1], strides = [1, 1]} : vector<1x4xf32> to vector<1x1xf32>
    %141 = vector.broadcast %140 : vector<1x1xf32> to vector<1x4xf32>
    %142 = arith.mulf %141, %131 : vector<1x4xf32>
    %143 = arith.subf %105, %142 : vector<1x4xf32>
    %144 = tpu.concatenate %135, %139, %143, %131 in 0 : vector<1x4xf32>, vector<1x4xf32>, vector<1x4xf32>, vector<1x4xf32> -> vector<4x4xf32>
    %cst_17 = arith.constant dense<0.000000e+00> : vector<4x128xf32>
    %145 = tpu.matmul %144, %8, %cst_17 {dimension_numbers = #tpu.dot_dimension_numbers<[1], [0], [0], [1], [0, 0, 1, 1], [], []>} : vector<4x4xf32>, vector<4x128xf32>, vector<4x128xf32> -> vector<4x128xf32>
    %cst_18 = arith.constant dense<0.000000e+00> : vector<128x128xf32>
    %146 = tpu.matmul %16, %145, %cst_18 {dimension_numbers = #tpu.dot_dimension_numbers<[1], [0], [0], [1], [0, 0, 1, 1], [], []>} : vector<128x4xf32>, vector<4x128xf32>, vector<128x128xf32> -> vector<128x128xf32>
    %c0_19 = arith.constant 0 : index
    %c0_20 = arith.constant 0 : index
    %147 = vector.load %arg6[%c0_19, %c0_20] : memref<4x32xf32, #tpu.memory_space<vmem>>, vector<4x32xf32>
    %cst_21 = arith.constant dense<0.000000e+00> : vector<4x32xf32>
    %148 = tpu.matmul %144, %147, %cst_21 {dimension_numbers = #tpu.dot_dimension_numbers<[1], [0], [0], [1], [0, 0, 1, 1], [], []>} : vector<4x4xf32>, vector<4x32xf32>, vector<4x32xf32> -> vector<4x32xf32>
    %cst_22 = arith.constant dense<0.000000e+00> : vector<128x32xf32>
    %149 = tpu.matmul %16, %148, %cst_22 {dimension_numbers = #tpu.dot_dimension_numbers<[1], [0], [0], [1], [0, 0, 1, 1], [], []>} : vector<128x4xf32>, vector<4x32xf32>, vector<128x32xf32> -> vector<128x32xf32>
    %cst_23 = arith.constant dense<0.000000e+00> : vector<16x128xf32>
    %150 = tpu.matmul %0, %146, %cst_23 {dimension_numbers = #tpu.dot_dimension_numbers<[1], [0], [0], [1], [0, 0, 1, 1], [], []>} : vector<16x128xf32>, vector<128x128xf32>, vector<16x128xf32> -> vector<16x128xf32>
    %c0_24 = arith.constant 0 : index
    %c0_25 = arith.constant 0 : index
    %151 = vector.load %arg11[%c0_24, %c0_25] : memref<16x128xf32, #tpu.memory_space<vmem>>, vector<16x128xf32>
    tpu.vector_store %arg11[%c0_24, %c0_25], %150 {strides = array<i32>} : memref<16x128xf32, #tpu.memory_space<vmem>>, vector<16x128xf32>,
    %cst_26 = arith.constant dense<0.000000e+00> : vector<16x32xf32>
    %152 = tpu.matmul %0, %149, %cst_26 {dimension_numbers = #tpu.dot_dimension_numbers<[1], [0], [0], [1], [0, 0, 1, 1], [], []>} : vector<16x128xf32>, vector<128x32xf32>, vector<16x32xf32> -> vector<16x32xf32>
    %c0_27 = arith.constant 0 : index
    %c0_28 = arith.constant 0 : index
    %153 = vector.load %arg7[%c0_27, %c0_28] : memref<1x32xf32, #tpu.memory_space<vmem>>, vector<1x32xf32>
    %154 = vector.broadcast %153 : vector<1x32xf32> to vector<16x32xf32>
    %155 = arith.addf %152, %154 : vector<16x32xf32>
    %cst_29 = arith.constant 0.000000e+00 : f32
    %156 = vector.broadcast %cst_29 : f32 to vector<16x32xf32>
    %157 = arith.maximumf %155, %156 : vector<16x32xf32>
    %c0_30 = arith.constant 0 : index
    %c0_31 = arith.constant 0 : index
    %158 = vector.load %arg8[%c0_30, %c0_31] : memref<32x8xf32, #tpu.memory_space<vmem>>, vector<32x8xf32>
    %cst_32 = arith.constant dense<0.000000e+00> : vector<16x8xf32>
    %159 = tpu.matmul %157, %158, %cst_32 {dimension_numbers = #tpu.dot_dimension_numbers<[1], [0], [0], [1], [0, 0, 1, 1], [], []>} : vector<16x32xf32>, vector<32x8xf32>, vector<16x8xf32> -> vector<16x8xf32>
    %c0_33 = arith.constant 0 : index
    %c0_34 = arith.constant 0 : index
    %160 = vector.load %arg9[%c0_33, %c0_34] : memref<1x8xf32, #tpu.memory_space<vmem>>, vector<1x8xf32>
    %161 = vector.broadcast %160 : vector<1x8xf32> to vector<16x8xf32>
    %162 = arith.addf %159, %161 : vector<16x8xf32>
    %c0_35 = arith.constant 0 : index
    %c0_36 = arith.constant 0 : index
    %163 = vector.load %arg10[%c0_35, %c0_36] : memref<16x8xf32, #tpu.memory_space<vmem>>, vector<16x8xf32>
    tpu.vector_store %arg10[%c0_35, %c0_36], %162 {strides = array<i32>} : memref<16x8xf32, #tpu.memory_space<vmem>>, vector<16x8xf32>,
    return
  }
  func.func @transform_0(%arg0: i32) -> (i32, i32) {
    %c0_i32 = arith.constant 0 : i32
    %c0_i32_0 = arith.constant 0 : i32
    %c0_i32_1 = arith.constant 0 : i32
    return %c0_i32, %c0_i32_0 : i32, i32
  }
  func.func @transform_1(%arg0: i32) -> (i32, i32) {
    %c0_i32 = arith.constant 0 : i32
    %c0_i32_0 = arith.constant 0 : i32
    %c0_i32_1 = arith.constant 0 : i32
    return %c0_i32, %c0_i32_0 : i32, i32
  }
  func.func @transform_2(%arg0: i32) -> (i32, i32) {
    %c0_i32 = arith.constant 0 : i32
    %c0_i32_0 = arith.constant 0 : i32
    %c0_i32_1 = arith.constant 0 : i32
    return %c0_i32, %c0_i32_0 : i32, i32
  }
  func.func @transform_3(%arg0: i32) -> (i32, i32) {
    %c0_i32 = arith.constant 0 : i32
    %c0_i32_0 = arith.constant 0 : i32
    %c0_i32_1 = arith.constant 0 : i32
    return %c0_i32, %c0_i32_0 : i32, i32
  }
  func.func @transform_4(%arg0: i32) -> (i32, i32) {
    %c0_i32 = arith.constant 0 : i32
    %c0_i32_0 = arith.constant 0 : i32
    return %arg0, %c0_i32 : i32, i32
  }
  func.func @transform_5(%arg0: i32) -> (i32, i32) {
    %c0_i32 = arith.constant 0 : i32
    %c0_i32_0 = arith.constant 0 : i32
    %c0_i32_1 = arith.constant 0 : i32
    return %c0_i32, %c0_i32_0 : i32, i32
  }
  func.func @transform_6(%arg0: i32) -> (i32, i32) {
    %c0_i32 = arith.constant 0 : i32
    %c0_i32_0 = arith.constant 0 : i32
    %c0_i32_1 = arith.constant 0 : i32
    return %c0_i32, %c0_i32_0 : i32, i32
  }
  func.func @transform_7(%arg0: i32) -> (i32, i32) {
    %c0_i32 = arith.constant 0 : i32
    %c0_i32_0 = arith.constant 0 : i32
    %c0_i32_1 = arith.constant 0 : i32
    return %c0_i32, %c0_i32_0 : i32, i32
  }
  func.func @transform_8(%arg0: i32) -> (i32, i32) {
    %c0_i32 = arith.constant 0 : i32
    %c0_i32_0 = arith.constant 0 : i32
    %c0_i32_1 = arith.constant 0 : i32
    return %c0_i32, %c0_i32_0 : i32, i32
  }
  func.func @transform_9(%arg0: i32) -> (i32, i32) {
    %c0_i32 = arith.constant 0 : i32
    %c0_i32_0 = arith.constant 0 : i32
    return %arg0, %c0_i32 : i32, i32
  }
  func.func @transform_10(%arg0: i32) -> (i32, i32) {
    %c0_i32 = arith.constant 0 : i32
    %c0_i32_0 = arith.constant 0 : i32
    return %arg0, %c0_i32 : i32, i32
  }
}

</mosaic_0001>

<bundles_post_ra>
// kernel: vpnet_forward.1
= control target key start
LH: loop header
LB: loop body
LE: loop exit
PB: predicated region body
PF: predicated region fallthrough
CT: control target
= control target key end

     0   :  { %v1751_v3 = vmov 0   ;;  %s2093_s0 = inlined_call_operand.vmem [shape: f32[4,1], index: 0, kind: input, shape index: {}]   ;;  %s2094_s1 = inlined_call_operand.vmem [shape: f32[1,4], index: 1, kind: input, shape index: {}]   ;;  %s2095_s2 = inlined_call_operand.vmem [shape: f32[1,128], index: 2, kind: input, shape index: {}]   ;;  %s2096_s3 = inlined_call_operand.vmem [shape: f32[128,1], index: 3, kind: input, shape index: {}]   ;;  %s2097_s4 = inlined_call_operand.vmem [shape: f32[16,128], index: 4, kind: input, shape index: {}]   ;;  %s2098_s5 = inlined_call_operand.vmem [shape: f32[4,32], index: 5, kind: input, shape index: {}]   ;;  %s2099_s6 = inlined_call_operand.vmem [shape: f32[1,32], index: 6, kind: input, shape index: {}]   ;;  %s2100_s7 = inlined_call_operand.vmem [shape: f32[32,8], index: 7, kind: input, shape index: {}]   ;;  %s2101_s8 = inlined_call_operand.vmem [shape: f32[1,8], index: 8, kind: input, shape index: {}]   ;;  %s2102_s9 = inlined_call_operand.vmem [shape: f32[16,8], index: 9, kind: output, shape index: {0}]   ;;  %s2103_s10 = inlined_call_operand.hbm [shape: f32[16,128], index: 10, kind: output, shape index: {1}]  }
   0x1   :  { %v56_v0 = vld [vmem:[%s2096_s3 + $0x10] sm:$0xff]  ;;  %v54_v1 = vld [vmem:[%s2096_s3] sm:$0xff]  ;;  %v57_v2 = vld [vmem:[%s2096_s3 + $0x18] sm:$0xff]  ;;  %1678 = vset.pattern.permute.xlu1 %v1751_v3  ;;  %1677 = vset.pattern.permute.xlu0 %v1751_v3 }
   0x2   :  { %v72_v4 = vsub.f32 0.0, %v56_v0  ;;  %v70_v5 = vsub.f32 0.0, %v54_v1  ;;  %v55_v6 = vld [vmem:[%s2096_s3 + $0x8] sm:$0xff]  ;;  %v73_v7 = vsub.f32 0.0, %v57_v2  ;;  %v58_v10 = vld [vmem:[%s2096_s3 + $0x20] sm:$0xff] }
   0x3   :  { %v71_v8 = vsub.f32 0.0, %v55_v6  ;;  %v59_v9 = vld [vmem:[%s2096_s3 + $0x28] sm:$0xff] }
   0x4   :  { %99 = vperm.xlu1 %1678, %v72_v4   ;;  %89 = vperm.xlu0 %1677, %v70_v5  }
   0x5   :  { %16 = vsyncpa [#allocation3], 0  ;;  %v75_v11 = vsub.f32 0.0, %v59_v9  ;;  %v74_v12 = vsub.f32 0.0, %v58_v10  ;;  %v61_v13 = vld [vmem:[%s2096_s3 + $0x38] sm:$0xff]  ;;  %v60_v14 = vld [vmem:[%s2096_s3 + $0x30] sm:$0xff] }
   0x6   :  { %v77_v15 = vsub.f32 0.0, %v61_v13  ;;  %v76_v16 = vsub.f32 0.0, %v60_v14  ;;  %v63_v17 = vld [vmem:[%s2096_s3 + $0x48] sm:$0xff]  ;;  %v62_v18 = vld [vmem:[%s2096_s3 + $0x40] sm:$0xff]  ;;  %v65_v21 = vld [vmem:[%s2096_s3 + $0x58] sm:$0xff]  ;;  %v1752_v31 = vmov 0.0|0.0  }
   0x7   :  { %v79_v19 = vsub.f32 0.0, %v63_v17  ;;  %v78_v20 = vsub.f32 0.0, %v62_v18  ;;  %v64_v22 = vld [vmem:[%s2096_s3 + $0x50] sm:$0xff]  ;;  %v81_v23 = vsub.f32 0.0, %v65_v21  ;;  %v67_v25 = vld [vmem:[%s2096_s3 + $0x68] sm:$0xff]  ;;  %v66_v26 = vld [vmem:[%s2096_s3 + $0x60] sm:$0xff]  ;;  %1571 = vmatprep.subr.bf16.mxu0 %v1752_v31 }
   0x8   :  { %104 = vperm.xlu1 %1678, %v73_v7   ;;  %94 = vperm.xlu0 %1677, %v71_v8   ;;  %v80_v24 = vsub.f32 0.0, %v64_v22  ;;  %v83_v27 = vsub.f32 0.0, %v67_v25  ;;  %v82_v28 = vsub.f32 0.0, %v66_v26  ;;  %v69_v29 = vld [vmem:[%s2096_s3 + $0x78] sm:$0xff]  ;;  %v68_v30 = vld [vmem:[%s2096_s3 + $0x70] sm:$0xff]  ;;  %v1753_v36 = vmov 0.0  }
   0x9   :  { %v85_v32 = vsub.f32 0.0, %v69_v29  ;;  %v84_v33 = vsub.f32 0.0, %v68_v30  ;;  %v37_v34 = vld [vmem:[%s2093_s0] sm:$0xf]  ;;  %1428 = vmatprep.subr.mxu1 %v1753_v36  ;;  %vm1754_vm0 = vmmov 0   ;;  %vm482_vm1 = vcmask 1043456  }
   0xa   :  { %v38_v35 = vsub.f32 0.0, %v37_v34  ;;  %1425 = vmatprep.mubr.msk.f32.mxu0 %vm1754_vm0, %v1753_v36  ;;  %1430 = vmatprep.mubr.msk.f32.mxu1 %vm1754_vm0, %v1753_v36  ;;  %v1876_v37 = vld [vmem:[%s2094_s1] ss:$0 sm:$0xff]  ;;  %vm472_vm3 = vcmask 1040384   ;;  %vm474_vm4 = vcmask 1041408   ;;  %vm476_vm5 = vcmask 1042432  }
   0xb   :  { %vm478_vm6 = vcmask 31744   ;;  %vm1146_vm7 = vcmask 261120  }
   0xc   :  { %114 = vperm.xlu1 %1678, %v75_v11   ;;  %109 = vperm.xlu0 %1677, %v74_v12  }
  0x10   :  { %124 = vperm.xlu1 %1678, %v77_v15   ;;  %119 = vperm.xlu0 %1677, %v76_v16  }
  0x14   :  { %134 = vperm.xlu1 %1678, %v79_v19   ;;  %129 = vperm.xlu0 %1677, %v78_v20  }
  0x18   :  { %144 = vperm.xlu1 %1678, %v81_v23   ;;  %139 = vperm.xlu0 %1677, %v80_v24  }
  0x1c   :  { %154 = vperm.xlu1 %1678, %v83_v27   ;;  %149 = vperm.xlu0 %1677, %v82_v28  }
  0x20   :  { %164 = vperm.xlu1 %1678, %v85_v32   ;;  %159 = vperm.xlu0 %1677, %v84_v33   ;;  %v1251_v32 = vld [vmem:[%s2095_s2] ss:$0 sm:$0xff] }
  0x24   :  { %42 = vperm.xlu0 %1677, %v38_v35  }
  0x83   :  { %v100_v38 = vpop.permute.xlu1 %99  ;;  %v90_v39 = vpop.permute.xlu0 %89 }
  0x84   :  { %v173_v40 = vmul.f32 %v1876_v37, %v90_v39  ;;  %v175_v41 = vmul.f32 %v1876_v37, %v100_v38 }
  0x86   :  { %v189_v44 = vmul.f32 1.442695, %v173_v40  ;;  %v193_v47 = vmul.f32 1.442695, %v175_v41 }
  0x87   :  { %v105_v42 = vpop.permute.xlu1 %104  ;;  %v95_v43 = vpop.permute.xlu0 %94 }
  0x88   :  { %v176_v45 = vmul.f32 %v1876_v37, %v105_v42  ;;  %v174_v46 = vmul.f32 %v1876_v37, %v95_v43  ;;  %1685 = vpow2.f32 %v189_v44 }
  0x8a   :  { %v191_v48 = vmul.f32 1.442695, %v174_v46  ;;  %v195_v49 = vmul.f32 1.442695, %v176_v45 }
  0x8b   :  { %v115_v50 = vpop.permute.xlu1 %114  ;;  %v110_v51 = vpop.permute.xlu0 %109 }
  0x8c   :  { %v178_v52 = vmul.f32 %v1876_v37, %v115_v50  ;;  %v177_v53 = vmul.f32 %v1876_v37, %v110_v51  ;;  %1687 = vpow2.f32 %v191_v48 }
  0x8d   :  { %1689 = vpow2.f32 %v193_v47 }
  0x8e   :  { %v199_v54 = vmul.f32 1.442695, %v178_v52  ;;  %1691 = vpow2.f32 %v195_v49  ;;  %v197_v55 = vmul.f32 1.442695, %v177_v53  ;;  %v221_v53 = vlaneseq }
  0x8f   :  { %v125_v56 = vpop.permute.xlu1 %124  ;;  %v120_v57 = vpop.permute.xlu0 %119 }
  0x90   :  { %v180_v58 = vmul.f32 %v1876_v37, %v125_v56  ;;  %v179_v59 = vmul.f32 %v1876_v37, %v120_v57  ;;  %1693 = vpow2.f32 %v199_v54  ;;  %v222_v54 = vshrl.u32 %v221_v53, 7 }
  0x91   :  { %1695 = vpow2.f32 %v197_v55  ;;  %v224_v55 = vand.u32 127, %v221_v53 }
  0x92   :  { %v203_v60 = vmul.f32 1.442695, %v180_v58  ;;  %v201_v61 = vmul.f32 1.442695, %v179_v59  ;;  %v1888_v2 = vpop.eup %1685 }
  0x93   :  { %v135_v62 = vpop.permute.xlu1 %134  ;;  %v130_v63 = vpop.permute.xlu0 %129  ;;  %vm225_vm2 = vcmp.eq.s32.totalorder %v222_v54, %v224_v55 }
  0x94   :  { %v182_v0 = vmul.f32 %v1876_v37, %v135_v62  ;;  %v181_v1 = vmul.f32 %v1876_v37, %v130_v63  ;;  %1697 = vpow2.f32 %v203_v60  ;;  %v1954_v56 = vsel %vm225_vm2, 1.0, %v1753_v36 }
  0x95   :  { %1699 = vpow2.f32 %v201_v61  ;;  %v228_v57 = vmul.f32 1e-05, %v1954_v56  ;;  %v1755_v61 = vmov 1  }
  0x96   :  { %v207_v3 = vmul.f32 1.442695, %v182_v0  ;;  %v1890_v4 = vpop.eup %1687  ;;  %v205_v5 = vmul.f32 1.442695, %v181_v1 }
  0x97   :  { %v145_v6 = vpop.permute.xlu1 %144  ;;  %v140_v7 = vpop.permute.xlu0 %139  ;;  %v1572_v11 = vpack.c.bf16 %v1890_v4, %v1888_v2 }
  0x98   :  { %v1892_v8 = vpop.eup %1689  ;;  %v184_v9 = vmul.f32 %v1876_v37, %v145_v6  ;;  %v183_v10 = vmul.f32 %v1876_v37, %v140_v7  ;;  %1701 = vpow2.f32 %v207_v3 }
  0x99   :  { %v1898_v12 = vpop.eup %1691  ;;  %1573 = vmatpush3.bf16.msra.mxu0 %v1572_v11  ;;  %1703 = vpow2.f32 %v205_v5 }
  0x9a   :  { %v211_v13 = vmul.f32 1.442695, %v184_v9  ;;  %v209_v14 = vmul.f32 1.442695, %v183_v10  ;;  %1574 = vmatprep.subr.bf16.mxu0 %v1752_v31  ;;  %v1901_v17 = vpop.eup %1693  ;;  %v1575_v20 = vpack.c.bf16 %v1898_v12, %v1892_v8 }
  0x9b   :  { %v155_v15 = vpop.permute.xlu1 %154  ;;  %v150_v16 = vpop.permute.xlu0 %149 }
  0x9c   :  { %v186_v18 = vmul.f32 %v1876_v37, %v155_v15  ;;  %v185_v19 = vmul.f32 %v1876_v37, %v150_v16  ;;  %v1907_v21 = vpop.eup %1695  ;;  %1705 = vpow2.f32 %v211_v13  ;;  %v1756_v15 = vmov 2  }
  0x9d   :  { %1576 = vmatpush3.bf16.msra.mxu0 %v1575_v20  ;;  %1707 = vpow2.f32 %v209_v14  ;;  %v1578_v29 = vpack.c.bf16 %v1901_v17, %v1907_v21 }
  0x9e   :  { %v215_v22 = vmul.f32 1.442695, %v186_v18  ;;  %v213_v23 = vmul.f32 1.442695, %v185_v19  ;;  %1577 = vmatprep.subr.bf16.mxu0 %v1752_v31  ;;  %v1910_v26 = vpop.eup %1697 }
  0x9f   :  { %v165_v24 = vpop.permute.xlu1 %164  ;;  %v160_v25 = vpop.permute.xlu0 %159 }
  0xa0   :  { %v188_v27 = vmul.f32 %v1876_v37, %v165_v24  ;;  %v187_v28 = vmul.f32 %v1876_v37, %v160_v25  ;;  %v1916_v30 = vpop.eup %1699  ;;  %1709 = vpow2.f32 %v215_v22 }
  0xa1   :  { %1579 = vmatpush3.bf16.msra.mxu0 %v1578_v29  ;;  %1711 = vpow2.f32 %v213_v23  ;;  %v1581_v39 = vpack.c.bf16 %v1910_v26, %v1916_v30 }
  0xa2   :  { %v219_v33 = vmul.f32 1.442695, %v188_v27  ;;  %v217_v34 = vmul.f32 1.442695, %v187_v28  ;;  %1580 = vmatprep.subr.bf16.mxu0 %v1752_v31  ;;  %v1922_v38 = vpop.eup %1701 }
  0xa3   :  { %v43_v35 = vpop.permute.xlu0 %42  ;;  %v1926_v40 = vpop.eup %1703 }
  0xa4   :  { %v51_v37 = vmul.f32 %v1251_v32, %v43_v35  ;;  %1713 = vpow2.f32 %v219_v33  ;;  %v1584_v43 = vpack.c.bf16 %v1922_v38, %v1926_v40 }
  0xa5   :  { %1582 = vmatpush3.bf16.msra.mxu0 %v1581_v39  ;;  %1715 = vpow2.f32 %v217_v34 }
  0xa6   :  { %v52_v41 = vmul.f32 1.442695, %v51_v37  ;;  %1583 = vmatprep.subr.bf16.mxu0 %v1752_v31  ;;  %v1929_v42 = vpop.eup %1705 }
  0xa7   :  { %v1933_v44 = vpop.eup %1707 }
  0xa8   :  { %1717 = vpow2.f32 %v52_v41  ;;  %v1587_v46 = vpack.c.bf16 %v1929_v42, %v1933_v44 }
  0xa9   :  { %1585 = vmatpush3.bf16.msra.mxu0 %v1584_v43 }
  0xaa   :  { %1586 = vmatprep.subr.bf16.mxu0 %v1752_v31  ;;  %v1936_v45 = vpop.eup %1709 }
  0xab   :  { %v1940_v47 = vpop.eup %1711 }
  0xac   :  { %v1590_v49 = vpack.c.bf16 %v1936_v45, %v1940_v47 }
  0xad   :  { %1588 = vmatpush3.bf16.msra.mxu0 %v1587_v46 }
  0xae   :  { %1589 = vmatprep.subr.bf16.mxu0 %v1752_v31  ;;  %v1943_v48 = vpop.eup %1713 }
  0xaf   :  { %v1947_v50 = vpop.eup %1715 }
  0xb0   :  { %v1593_v52 = vpack.c.bf16 %v1943_v48, %v1947_v50 }
  0xb1   :  { %1591 = vmatpush3.bf16.msra.mxu0 %v1590_v49 }
  0xb2   :  { %v1718_v51 = vpop.eup %1717  ;;  %1592 = vmatprep.subr.bf16.mxu0 %v1752_v31 }
  0xb3   :  { %1429 = vmatpush3.msk.msra.mxu1 %vm482_vm1, %v1718_v51 }
  0xb5   :  { %1594 = vmatpush3.bf16.msra.mxu0 %v1593_v52  ;;  %v1757_v52 = vmov 3  }
  0xb8   :  { %1426 = vmatmul.mubr.f32.vlgmr.msra.gmra.mrb[0].mxu0 %v1718_v51 }
 0x18b   :  { %v295_v58 = vpop.f32.mrb[0].mxu0 }
 0x18c   :  { %v296_v59 = vadd.f32 %v295_v58, %v228_v57  ;;  %v1427_v60 = vpop.f32.mrb[1].mxu0 }
 0x18e   :  { %1719 = vrcp.f32 %v296_v59  ;;  %310 = vperm.xlu0 %1677, %v296_v59  }
 0x192   :  { %1680 = vset.pattern.permute.xlu0 %v1755_v61 }
 0x198   :  { %v1720_v31 = vpop.eup %1719 }
 0x199   :  { %303 = vperm.xlu1 %1678, %v1720_v31  }
 0x19d   :  { %1679 = vset.pattern.permute.xlu1 %v1755_v61 }
 0x20d   :  { %v311_v3 = vpop.permute.xlu0 %310 }
 0x218   :  { %v304_v62 = vpop.permute.xlu1 %303 }
 0x219   :  { %v306_v63 = vmul.f32 %v304_v62, %v296_v59  ;;  %v307_v16 = vmul.f32 %v1954_v56, %v304_v62 }
 0x21b   :  { %v314_v0 = vrot.slane %v306_v63, 7  ;;  %v323_v1 = vrot.slane %v306_v63, 6  ;;  %v331_v10 = vrot.slane %v306_v63, 5  ;;  %v319_v18 = vrot.slane %v307_v16, 7 }
 0x21c   :  { %v327_v53 = vrot.slane %v307_v16, 6  ;;  %v335_v58 = vrot.slane %v307_v16, 5 }
 0x21d   :  { %v316_v5 = vmul.f32 %v314_v0, %v311_v3  ;;  %v325_v6 = vmul.f32 %v323_v1, %v311_v3  ;;  %v333_v11 = vmul.f32 %v331_v10, %v311_v3  ;;  %v321_v19 = vmul.f32 %v319_v18, %v311_v3 }
 0x21e   :  { %v329_v55 = vmul.f32 %v327_v53, %v311_v3  ;;  %v337_v62 = vmul.f32 %v335_v58, %v311_v3 }
 0x21f   :  { %v317_v7 = vsub.f32 %v296_v59, %v316_v5  ;;  %v326_v9 = vsub.f32 %v296_v59, %v325_v6  ;;  %v334_v14 = vsub.f32 %v296_v59, %v333_v11  ;;  %v322_v20 = vsub.f32 %v1954_v56, %v321_v19 }
 0x220   :  { %v330_v59 = vsub.f32 %v1954_v56, %v329_v55  ;;  %v338_v10 = vsub.f32 %v1954_v56, %v337_v62 }
 0x221   :  { %1721 = vrcp.f32 %v317_v7  ;;  %364 = vperm.xlu0 %1680, %v326_v9  }
 0x225   :  { %1681 = vset.pattern.permute.xlu0 %v1756_v15 }
 0x22b   :  { %v1722_v13 = vpop.eup %1721 }
 0x22c   :  { %343 = vperm.xlu1 %1679, %v1722_v13  }
 0x230   :  { %377 = vperm.xlu1 %1679, %v334_v14  }
 0x234   :  { %349 = vperm.xlu1 %1679, %v306_v63  }
 0x238   :  { %1682 = vset.pattern.permute.xlu1 %v1756_v15 }
 0x2a0   :  { %v365_v29 = vpop.permute.xlu0 %364 }
 0x2ab   :  { %v344_v22 = vpop.permute.xlu1 %343 }
 0x2ac   :  { %v1959_v23 = vmul.f32 %v344_v22, %v317_v7  ;;  %v1961_v24 = vmul.f32 %v344_v22, %v322_v20 }
 0x2ae   :  { %v367_v25 = vrot.slane %v1959_v23, 7  ;;  %v380_v27 = vrot.slane %v1959_v23, 6  ;;  %v384_v28 = vrot.slane %v1961_v24, 6  ;;  %v353_v41 = vrot.slane %v1959_v23, 1 }
 0x2af   :  { %v378_v32 = vpop.permute.xlu1 %377  ;;  %v371_v54 = vrot.slane %v1961_v24, 7  ;;  %v358_v31 = vrot.slane %v1961_v24, 1 }
 0x2b0   :  { %v369_v33 = vmul.f32 %v367_v25, %v365_v29  ;;  %v382_v34 = vmul.f32 %v380_v27, %v378_v32  ;;  %v386_v35 = vmul.f32 %v384_v28, %v378_v32 }
 0x2b1   :  { %v373_v57 = vmul.f32 %v371_v54, %v365_v29 }
 0x2b2   :  { %v370_v37 = vsub.f32 %v326_v9, %v369_v33  ;;  %v383_v39 = vsub.f32 %v334_v14, %v382_v34  ;;  %v387_v25 = vsub.f32 %v338_v10, %v386_v35 }
 0x2b3   :  { %v350_v43 = vpop.permute.xlu1 %349  ;;  %v374_v61 = vsub.f32 %v330_v59, %v373_v57 }
 0x2b4   :  { %1723 = vrcp.f32 %v370_v37  ;;  %v355_v46 = vmul.f32 %v353_v41, %v350_v43  ;;  %426 = vperm.xlu1 %1682, %v383_v39   ;;  %v360_v0 = vmul.f32 %v358_v31, %v350_v43 }
 0x2b6   :  { %v356_v49 = vsub.f32 %v306_v63, %v355_v46  ;;  %v361_v18 = vsub.f32 %v307_v16, %v360_v0 }
 0x2b8   :  { %399 = vperm.xlu1 %1682, %v356_v49  }
 0x2bc   :  { %1683 = vset.pattern.permute.xlu1 %v1757_v52 }
 0x2be   :  { %v1724_v51 = vpop.eup %1723 }
 0x2bf   :  { %392 = vperm.xlu0 %1681, %v1724_v51  }
 0x2c3   :  { %413 = vperm.xlu0 %1681, %v1959_v23  }
 0x2c7   :  { %1684 = vset.pattern.permute.xlu0 %v1757_v52 }
 0x333   :  { %v427_v60 = vpop.permute.xlu1 %426 }
 0x337   :  { %v400_v11 = vpop.permute.xlu1 %399 }
 0x33e   :  { %v393_v63 = vpop.permute.xlu0 %392 }
 0x33f   :  { %v395_v1 = vmul.f32 %v393_v63, %v370_v37  ;;  %v396_v5 = vmul.f32 %v393_v63, %v374_v61  ;;  %v752_v63 = vld [vmem:[%s2098_s5] sm:$0xf] }
 0x341   :  { %v408_v6 = vrot.slane %v396_v5, 2  ;;  %v429_v7 = vrot.slane %v395_v1, 7  ;;  %v420_v9 = vrot.slane %v396_v5, 1  ;;  %v403_v14 = vrot.slane %v395_v1, 2 }
 0x342   :  { %v414_v13 = vpop.permute.xlu0 %413  ;;  %v433_v15 = vrot.slane %v396_v5, 7  ;;  %v416_v56 = vrot.slane %v395_v1, 1 }
 0x343   :  { %v410_v19 = vmul.f32 %v408_v6, %v400_v11  ;;  %v431_v20 = vmul.f32 %v429_v7, %v427_v60  ;;  %v422_v22 = vmul.f32 %v420_v9, %v414_v13  ;;  %v405_v27 = vmul.f32 %v403_v14, %v400_v11 }
 0x344   :  { %v435_v3 = vmul.f32 %v433_v15, %v427_v60  ;;  %v418_v37 = vmul.f32 %v416_v56, %v414_v13 }
 0x345   :  { %v432_v28 = vsub.f32 %v383_v39, %v431_v20  ;;  %v423_v29 = vsub.f32 %v1961_v24, %v422_v22  ;;  %v411_v32 = vsub.f32 %v361_v18, %v410_v19  ;;  %v406_v33 = vsub.f32 %v356_v49, %v405_v27 }
 0x346   :  { %v436_v34 = vsub.f32 %v387_v25, %v435_v3  ;;  %v419_v16 = vsub.f32 %v1959_v23, %v418_v37 }
 0x347   :  { %1725 = vrcp.f32 %v432_v28  ;;  %447 = vperm.xlu0 %1684, %v406_v33  }
 0x351   :  { %v1726_v41 = vpop.eup %1725 }
 0x352   :  { %441 = vperm.xlu1 %1683, %v1726_v41  }
 0x356   :  { %457 = vperm.xlu1 %1683, %v419_v16  }
 0x35a   :  { %465 = vperm.xlu1 %1683, %v395_v1  }
 0x3c6   :  { %v448_v39 = vpop.permute.xlu0 %447 }
 0x3d1   :  { %v442_v43 = vpop.permute.xlu1 %441 }
 0x3d2   :  { %v444_v35 = vmul.f32 %v442_v43, %v436_v34 }
 0x3d4   :  { %v451_v46 = vrot.slane %v444_v35, 3  ;;  %v460_v51 = vrot.slane %v444_v35, 2  ;;  %v468_v55 = vrot.slane %v444_v35, 1 }
 0x3d5   :  { %v458_v52 = vpop.permute.xlu1 %457 }
 0x3d6   :  { %v453_v24 = vmul.f32 %v451_v46, %v448_v39  ;;  %v462_v53 = vmul.f32 %v460_v51, %v458_v52 }
 0x3d8   :  { %v454_v49 = vsub.f32 %v411_v32, %v453_v24  ;;  %v463_v54 = vsub.f32 %v423_v29, %v462_v53 }
 0x3d9   :  { %v466_v57 = vpop.permute.xlu1 %465 }
 0x3da   :  { %v473_v58 = vsel %vm472_vm3, %v454_v49, %v463_v54  ;;  %v470_v59 = vmul.f32 %v468_v55, %v466_v57  ;;  %v1137_v57 = vld [vmem:[%s2100_s7 + $0x10] sm:$0xff] }
 0x3dc   :  { %v471_v60 = vsub.f32 %v396_v5, %v470_v59 }
 0x3de   :  { %v475_v23 = vsel %vm474_vm4, %v473_v58, %v471_v60  ;;  %v1138_v58 = vld [vmem:[%s2100_s7 + $0x18] sm:$0xff] }
 0x3df   :  { %v477_v31 = vsel %vm476_vm5, %v475_v23, %v444_v35  ;;  %v1663_v59 = vpack.c.bf16 %v1138_v58, %v1137_v57 }
 0x3e0   :  { %1431 = vmatmul.mubr.msk.f32.vlgmr.msra.gmra.mrb[0].mxu1 %vm478_vm6, %v477_v31 }
 0x3e1   :  { %1435 = vmatprep.mubr.msk.f32.mxu1 %vm478_vm6, %v1888_v2 }
 0x4b3   :  { %v552_v61 = vpop.f32.mrb[0].mxu1 }
 0x4b4   :  { %v1432_v62 = vpop.f32.mrb[1].mxu1  ;;  %1433 = vmatprep.subr.msk.mxu1 %vm482_vm1, %v552_v61 }
 0x4b5   :  { %1434 = vmatpush3.msk.msra.mxu1 %vm482_vm1, %v552_v61 }
 0x4b6   :  { %1436 = vmatmul.mubr.msk.f32.vlgmr.msra.gmra.mrb[2].mxu1 %vm478_vm6, %v1890_v4  ;;  %1459 = vmatprep.subr.mxu1 %v1753_v36 }
 0x4b7   :  { %1438 = vmatprep.mubr.msk.f32.mxu1 %vm478_vm6, %v1892_v8  ;;  %1460 = vmatpush3.msk.msra.mxu1 %vm482_vm1, %v752_v63 }
 0x4ba   :  { %1439 = vmatmul.mubr.msk.f32.gmra.mrb[4].mxu1 %vm478_vm6, %v1898_v12 }
 0x4bb   :  { %1441 = vmatprep.mubr.msk.f32.mxu1 %vm478_vm6, %v1907_v21 }
 0x4be   :  { %1442 = vmatmul.mubr.msk.f32.gmra.mrb[6].mxu1 %vm478_vm6, %v1901_v17 }
 0x4bf   :  { %1444 = vmatprep.mubr.msk.f32.mxu1 %vm478_vm6, %v1916_v30 }
 0x4c2   :  { %1445 = vmatmul.mubr.msk.f32.gmra.mrb[8].mxu1 %vm478_vm6, %v1910_v26 }
 0x4c3   :  { %1447 = vmatprep.mubr.msk.f32.mxu1 %vm478_vm6, %v1926_v40 }
 0x4c6   :  { %1448 = vmatmul.mubr.msk.f32.gmra.mrb[10].mxu1 %vm478_vm6, %v1922_v38 }
 0x4c7   :  { %1450 = vmatprep.mubr.msk.f32.mxu1 %vm478_vm6, %v1933_v44 }
 0x4ca   :  { %1451 = vmatmul.mubr.msk.f32.gmra.mrb[12].mxu1 %vm478_vm6, %v1929_v42 }
 0x4cb   :  { %1453 = vmatprep.mubr.msk.f32.mxu1 %vm478_vm6, %v1940_v47 }
 0x4ce   :  { %1454 = vmatmul.mubr.msk.f32.gmra.mrb[14].mxu1 %vm478_vm6, %v1936_v45 }
 0x4cf   :  { %1456 = vmatprep.mubr.msk.f32.mxu1 %vm478_vm6, %v1947_v50 }
 0x4d2   :  { %1457 = vmatmul.mubr.msk.f32.gmra.mrb[16].mxu1 %vm478_vm6, %v1943_v48 }
 0x4d3   :  { %1461 = vmatprep.mubr.msk.f32.mxu1 %vm1754_vm0, %v1753_v36 }
 0x4d6   :  { %1462 = vmatmul.mubr.msk.f32.vlgmr.msra.gmra.mrb[18].mxu1 %vm478_vm6, %v477_v31  ;;  %v1292_v31 = vld [vmem:[%s2099_s6] ss:$0 sm:$0xff] }
 0x4d7   :  { %1466 = vmatprep.mubr.msk.f32.mxu1 %vm478_vm6, %v1888_v2 }
 0x589   :  { %v1437_v0 = vpop.f32.mrb[2].mxu1 }
 0x58a   :  { %v673_v1 = vpop.f32.mrb[3].mxu1 }
 0x58b   :  { %v1595_v5 = vpack.c.bf16 %v1437_v0, %v673_v1 }
 0x58d   :  { %v1440_v6 = vpop.f32.mrb[4].mxu1  ;;  %1596 = vmatprep.subr.bf16.mxu0 %v1595_v5 }
 0x58e   :  { %v683_v7 = vpop.f32.mrb[5].mxu1  ;;  %1598 = vmatpush3.bf16.msra.mxu0 %v1595_v5 }
 0x58f   :  { %v1599_v9 = vpack.c.bf16 %v1440_v6, %v683_v7 }
 0x591   :  { %v1443_v10 = vpop.f32.mrb[6].mxu1  ;;  %1600 = vmatprep.subr.bf16.mxu0 %v1599_v9 }
 0x592   :  { %v693_v11 = vpop.f32.mrb[7].mxu1  ;;  %1602 = vmatpush3.bf16.msra.mxu0 %v1599_v9 }
 0x593   :  { %v1603_v13 = vpack.c.bf16 %v1443_v10, %v693_v11 }
 0x595   :  { %v1446_v14 = vpop.f32.mrb[8].mxu1  ;;  %1604 = vmatprep.subr.bf16.mxu0 %v1603_v13 }
 0x596   :  { %v703_v36 = vpop.f32.mrb[9].mxu1  ;;  %1606 = vmatpush3.bf16.msra.mxu0 %v1603_v13 }
 0x597   :  { %v1607_v15 = vpack.c.bf16 %v1446_v14, %v703_v36 }
 0x599   :  { %v1449_v18 = vpop.f32.mrb[10].mxu1  ;;  %1608 = vmatprep.subr.bf16.mxu0 %v1607_v15 }
 0x59a   :  { %v713_v2 = vpop.f32.mrb[11].mxu1  ;;  %1610 = vmatpush3.bf16.msra.mxu0 %v1607_v15 }
 0x59b   :  { %v1611_v19 = vpack.c.bf16 %v1449_v18, %v713_v2 }
 0x59d   :  { %v1452_v20 = vpop.f32.mrb[12].mxu1  ;;  %1612 = vmatprep.subr.bf16.mxu0 %v1611_v19 }
 0x59e   :  { %v723_v22 = vpop.f32.mrb[13].mxu1  ;;  %1614 = vmatpush3.bf16.msra.mxu0 %v1611_v19 }
 0x59f   :  { %v1615_v25 = vpack.c.bf16 %v1452_v20, %v723_v22 }
 0x5a1   :  { %v1455_v27 = vpop.f32.mrb[14].mxu1  ;;  %1616 = vmatprep.subr.bf16.mxu0 %v1615_v25 }
 0x5a2   :  { %v733_v3 = vpop.f32.mrb[15].mxu1  ;;  %1618 = vmatpush3.bf16.msra.mxu0 %v1615_v25 }
 0x5a3   :  { %v1619_v28 = vpack.c.bf16 %v1455_v27, %v733_v3 }
 0x5a5   :  { %v1458_v29 = vpop.f32.mrb[16].mxu1  ;;  %1620 = vmatprep.subr.bf16.mxu0 %v1619_v28 }
 0x5a6   :  { %v743_v32 = vpop.f32.mrb[17].mxu1  ;;  %1622 = vmatpush3.bf16.msra.mxu0 %v1619_v28 }
 0x5a7   :  { %v1623_v33 = vpack.c.bf16 %v1458_v29, %v743_v32 }
 0x5a9   :  { %v822_v34 = vpop.f32.mrb[18].mxu1  ;;  %1624 = vmatprep.subr.bf16.mxu0 %v1623_v33 }
 0x5aa   :  { %v1463_v56 = vpop.f32.mrb[19].mxu1  ;;  %1464 = vmatprep.subr.msk.mxu1 %vm482_vm1, %v822_v34  ;;  %1626 = vmatpush3.bf16.msra.mxu0 %v1623_v33 }
 0x5ab   :  { %1465 = vmatpush3.msk.msra.mxu1 %vm482_vm1, %v822_v34 }
 0x5ac   :  { %1467 = vmatmul.mubr.msk.f32.vlgmr.msra.gmra.mrb[20].mxu1 %vm478_vm6, %v1890_v4  ;;  %v35_v4 = vld [vmem:[%s2097_s4] sm:$0xff] }
 0x5ad   :  { %1469 = vmatprep.mubr.msk.f32.mxu1 %vm478_vm6, %v1892_v8  ;;  %v36_v8 = vld [vmem:[%s2097_s4 + $0x8] sm:$0xff]  ;;  %1522 = vmatprep.mubr.f32.mxu0 %v35_v4 }
 0x5ae   :  { %1523 = vmatmul.mubr.f32.vlgmr.msra.gmra.mrb[2].mxu0 %v36_v8 }
 0x5b0   :  { %1470 = vmatmul.mubr.msk.f32.gmra.mrb[22].mxu1 %vm478_vm6, %v1898_v12  ;;  %v1135_v12 = vld [vmem:[%s2100_s7] sm:$0xff] }
 0x5b1   :  { %1472 = vmatprep.mubr.msk.f32.mxu1 %vm478_vm6, %v1907_v21 }
 0x5b4   :  { %1473 = vmatmul.mubr.msk.f32.gmra.mrb[24].mxu1 %vm478_vm6, %v1901_v17  ;;  %v1136_v17 = vld [vmem:[%s2100_s7 + $0x8] sm:$0xff]  ;;  %s1758_s7 = smov [#allocation2]  }
 0x5b5   :  { %1475 = vmatprep.mubr.msk.f32.mxu1 %vm478_vm6, %v1916_v30  ;;  %v1659_v21 = vpack.c.bf16 %v1136_v17, %v1135_v12  ;;  %s1238_s21 = sshll.u32 %s1758_s7, 4  ;;  %s1239_s21 = int_to_ptr.vmem [resolvable:$true] %s1238_s21 }
 0x5b6   :  { %s1727_s22 = scalar_lea.vmem %s1239_s21, 256  ;;  %p1732_p1 = scmp.lt.s32.totalorder %s1239_s21, %s1239_s21 }
 0x5b7   :  { %1660 = vmatprep.subr.bf16.mxu0 %v1659_v21  ;;  %p1728_p0 = scmp.ne.s32.totalorder %s1239_s21, %s1727_s22  ;;  %p1733_p2 = scmp.lt.s32.totalorder %s1727_s22, %s1727_s22 }
 0x5b8   :  { %1476 = vmatmul.mubr.msk.f32.gmra.mrb[26].mxu1 %vm478_vm6, %v1910_v26  ;;  %1662 = vmatpush3.bf16.msra.mxu0 %v1659_v21 }
 0x5b9   :  { %1478 = vmatprep.mubr.msk.f32.mxu1 %vm478_vm6, %v1926_v40  ;;  %1664 = vmatprep.subr.bf16.mxu0 %v1663_v59  ;;  %p1734_p3 = por %p1733_p2, %p1732_p1 }
 0x5bb   :  { %p1735_p4 = pnand %p1734_p3, %p1728_p0 }
 0x5bc   :  { %1479 = vmatmul.mubr.msk.f32.gmra.mrb[28].mxu1 %vm478_vm6, %v1922_v38  ;;  %1666 = vmatpush3.bf16.msra.mxu0 %v1663_v59 }
 0x5bd   :  { %1481 = vmatprep.mubr.msk.f32.mxu1 %vm478_vm6, %v1933_v44 }
 0x5c0   :  { %1482 = vmatmul.mubr.msk.f32.gmra.mrb[30].mxu1 %vm478_vm6, %v1929_v42 }
 0x5c1   :  { %1484 = vmatprep.mubr.msk.f32.mxu1 %vm478_vm6, %v1940_v47 }
 0x5c4   :  { %1485 = vmatmul.mubr.msk.f32.gmra.mrb[32].mxu1 %vm478_vm6, %v1936_v45 }
 0x5c5   :  { %1487 = vmatprep.mubr.msk.f32.mxu1 %vm478_vm6, %v1947_v50 }
 0x5c8   :  { %1488 = vmatmul.mubr.msk.f32.gmra.mrb[34].mxu1 %vm478_vm6, %v1943_v48 }
 0x5c9   :  { %1557 = vmatprep.mubr.f32.mxu1 %v35_v4 }
 0x67f   :  { %v1468_v26 = vpop.f32.mrb[20].mxu1 }
 0x680   :  { %v895_v30 = vpop.f32.mrb[21].mxu1 }
 0x681   :  { %v1627_v38 = vpack.c.bf16 %v1468_v26, %v895_v30  ;;  %v1524_v60 = vpop.f32.mrb[2].mxu0 }
 0x682   :  { %1050 = vst [vmem:[#allocation2 + $0x8] sm:$0xff] %v1524_v60  ;;  %v1040_v23 = vpop.f32.mrb[3].mxu0 }
 0x683   :  { %v1471_v40 = vpop.f32.mrb[22].mxu1  ;;  %1628 = vmatprep.subr.bf16.mxu1 %v1627_v38  ;;  %1049 = vst [vmem:[#allocation2] sm:$0xff] %v1040_v23 }
 0x684   :  { %v905_v42 = vpop.f32.mrb[23].mxu1  ;;  %1630 = vmatpush3.bf16.msra.mxu1 %v1627_v38 }
 0x685   :  { %v1631_v44 = vpack.c.bf16 %v1471_v40, %v905_v42 }
 0x687   :  { %v1474_v45 = vpop.f32.mrb[24].mxu1  ;;  %1632 = vmatprep.subr.bf16.mxu1 %v1631_v44 }
 0x688   :  { %v915_v47 = vpop.f32.mrb[25].mxu1  ;;  %1634 = vmatpush3.bf16.msra.mxu1 %v1631_v44 }
 0x689   :  { %v1635_v48 = vpack.c.bf16 %v1474_v45, %v915_v47 }
 0x68b   :  { %v1477_v50 = vpop.f32.mrb[26].mxu1  ;;  %1636 = vmatprep.subr.bf16.mxu1 %v1635_v48 }
 0x68c   :  { %v925_v37 = vpop.f32.mrb[27].mxu1  ;;  %1638 = vmatpush3.bf16.msra.mxu1 %v1635_v48 }
 0x68d   :  { %v1639_v41 = vpack.c.bf16 %v1477_v50, %v925_v37 }
 0x68f   :  { %v1480_v16 = vpop.f32.mrb[28].mxu1  ;;  %1640 = vmatprep.subr.bf16.mxu1 %v1639_v41 }
 0x690   :  { %v935_v43 = vpop.f32.mrb[29].mxu1  ;;  %1642 = vmatpush3.bf16.msra.mxu1 %v1639_v41 }
 0x691   :  { %v1643_v35 = vpack.c.bf16 %v1480_v16, %v935_v43 }
 0x693   :  { %v1483_v46 = vpop.f32.mrb[30].mxu1  ;;  %1644 = vmatprep.subr.bf16.mxu1 %v1643_v35 }
 0x694   :  { %v945_v51 = vpop.f32.mrb[31].mxu1  ;;  %1646 = vmatpush3.bf16.msra.mxu1 %v1643_v35 }
 0x695   :  { %v1647_v39 = vpack.c.bf16 %v1483_v46, %v945_v51 }
 0x697   :  { %v1486_v52 = vpop.f32.mrb[32].mxu1  ;;  %1648 = vmatprep.subr.bf16.mxu1 %v1647_v39 }
 0x698   :  { %v955_v24 = vpop.f32.mrb[33].mxu1  ;;  %1650 = vmatpush3.bf16.msra.mxu1 %v1647_v39 }
 0x699   :  { %v1651_v53 = vpack.c.bf16 %v1486_v52, %v955_v24 }
 0x69b   :  { %v1489_v49 = vpop.f32.mrb[34].mxu1  ;;  %1652 = vmatprep.subr.bf16.mxu1 %v1651_v53 }
 0x69c   :  { %v965_v54 = vpop.f32.mrb[35].mxu1  ;;  %1654 = vmatpush3.bf16.msra.mxu1 %v1651_v53 }
 0x69d   :  { %v1655_v55 = vpack.c.bf16 %v1489_v49, %v965_v54 }
 0x69f   :  { %1656 = vmatprep.subr.bf16.mxu1 %v1655_v55 }
 0x6a0   :  { %1658 = vmatpush3.bf16.msra.mxu1 %v1655_v55 }
 0x6a3   :  { %1558 = vmatmul.mubr.f32.vlgmr.msra.gmra.mrb[36].mxu1 %v36_v8 }
 0x776   :  { %v1559_v61 = vpop.f32.mrb[36].mxu1 }
 0x777   :  { %v1130_v62 = vadd.f32 %v1559_v61, %v1292_v31  ;;  %v1124_v63 = vpop.f32.mrb[37].mxu1 }
 0x778   :  { %v1125_v0 = vadd.f32 %v1292_v31, %v1124_v63 }
 0x779   :  { %v1134_v5 = vmax.f32 %v1130_v62, 0.0 }
 0x77a   :  { %v1133_v1 = vmax.f32 %v1125_v0, 0.0 }
 0x77c   :  { %1568 = vmatprep.mubr.msk.f32.mxu0 %vm1146_vm7, %v1133_v1 }
 0x77d   :  { %1569 = vmatmul.mubr.msk.f32.vlgmr.msra.gmra.mrb[4].mxu0 %vm1146_vm7, %v1134_v5 }
 0x77e   :  { %1738 = shalt.err (!%p1735_p4)
}
 0x77f   :  { %s1739_s24 = scalar_lea.hbm %s2103_s10, 256 }
 0x780   :  { %p1740_p5 = scmp.ne.s32.totalorder %s2103_s10, %s1739_s24  ;;  %p1743_p6 = scmp.lt.u32.totalorder %s1739_s24, %s2103_s10 }
 0x782   :  { %p1745_p7 = pnand %p1743_p6, %p1740_p5 }
 0x784   :  { %1748 = shalt.err (!%p1745_p7)
}
 0x785   :  { %s1759_s0 = smov 128   ;;  %s1760_s1 = smov 8   ;;  %v1293_v6 = vld [vmem:[%s2101_s8] ss:$0 sm:$0xff]  ;;  %vm1228_vm8 = vcmask 64512  }
 0x786   :  { %1244 = dma.vmem_to_hbm [thread:$0]  %s1239_s21, 256, %s2103_s10, [#allocation3], %s1759_s0, %s1759_s0, %s1760_s1  }
 0x850   :  { %v1570_v7 = vpop.f32.mrb[4].mxu0 }
 0x851   :  { %v1225_v9 = vadd.f32 %v1570_v7, %v1293_v6  ;;  %v1219_v10 = vpop.f32.mrb[5].mxu0 }
 0x852   :  { %v1220_v11 = vadd.f32 %v1293_v6, %v1219_v10 }
 0x853   :  { %1230 = vst.msk [vmem:[%s2102_s9 + $0x8] sm:$0xff] %vm1228_vm8, %v1225_v9 }
 0x854   :  { %1229 = vst.msk [vmem:[%s2102_s9] sm:$0xff] %vm1228_vm8, %v1220_v11 }
 0x855   :  { %1749 = dma.done.wait [#allocation3], 256  }
 0x856   :  { %1750 = vsyncadd [#allocation3], 4294967040 }
 0x857   :  { %1250 = vsyncpa [#allocation3], 1 }

</bundles_post_ra>
